<compile_context>
chip_gen: v7x
topology: tpu7x:2x2x1
jax: 0.10.0
libtpu: 0.0.40
codegen_flags: <defaults>
</compile_context>

<pallas_src>
import jax
import jax.numpy as jnp
from jax.experimental import pallas as pl
from jax.experimental.pallas import tpu as pltpu


LANES = 1024                 # lane-dense last dim (multiple of 128)
TILE_ROWS = 512              # 512 x 1024 x 4B = 2 MiB per block buffer
_MIN_PALLAS_ELEMENTS = 1 << 16   # below this, plain XLA wins


def _ste_kernel(x_ref, o_ref):
    # elementwise straight-through estimator forward: (x > 0) -> 1.0 else 0.0
    o_ref[...] = (x_ref[...] > 0).astype(o_ref.dtype)


def _ste_pallas_2d(x2: jax.Array) -> jax.Array:
    rows, lanes = x2.shape
    tile_rows = min(TILE_ROWS, rows)          # rows is a multiple of 8
    grid = (pl.cdiv(rows, tile_rows),)
    return pl.pallas_call(
        _ste_kernel,
        out_shape=jax.ShapeDtypeStruct((rows, lanes), jnp.float32),
        grid_spec=pltpu.PrefetchScalarGridSpec(
            num_scalar_prefetch=0,
            grid=grid,
            in_specs=[pl.BlockSpec((tile_rows, lanes), lambda i: (i, 0))],
            out_specs=pl.BlockSpec((tile_rows, lanes), lambda i: (i, 0)),
        ),
        compiler_params=pltpu.CompilerParams(
            dimension_semantics=("parallel",),
            vmem_limit_bytes=32 * 1024 * 1024,
        ),
    )(x2)


def straight_through_estimator(x: jax.Array, *, force_pallas: bool = False) -> jax.Array:
    """Forward of StraightThroughEstimator: (x > 0).astype(float32)."""
    orig_shape = x.shape
    total = x.size

    if total == 0:
        return jnp.zeros(orig_shape, jnp.float32)

    if not force_pallas and total < _MIN_PALLAS_ELEMENTS:
        # Tiny input: let XLA fuse the compare instead of paying the
        # pallas_call custom-call boundary.
        return (x > 0).astype(jnp.float32)

    # Pad flat length to a multiple of 8*LANES so the slab is (8,128)-aligned
    # (rows % 8 == 0), then tile over rows.
    flat = x.reshape(-1)
    chunk = 8 * LANES
    padded_total = ((total + chunk - 1) // chunk) * chunk
    if padded_total != total:
        flat = jnp.pad(flat, (0, padded_total - total))
    x2 = flat.reshape(padded_total // LANES, LANES)

    out2 = _ste_pallas_2d(x2)
    return out2.reshape(-1)[:total].reshape(orig_shape)


if __name__ == "__main__":
    key = jax.random.PRNGKey(0)
    k_small, k_big = jax.random.split(key)

    # 1) NCHW input matching the module's conv-style usage (forced through
    #    the Pallas kernel even though it is below the size gate).
    x = jax.random.normal(k_small, (2, 4, 16, 16), dtype=jnp.float32)
    y = straight_through_estimator(x, force_pallas=True)
    y = jax.block_until_ready(y)
    y_ref = (x > 0).astype(jnp.float32)
    assert y.shape == x.shape
    assert y.dtype == jnp.float32
    assert bool(jnp.all(y == y_ref))

    # 2) Larger, ragged input: exercises the padding path and a multi-tile
    #    grid (grid > 1) through the same kernel.
    x_big = jax.random.normal(k_big, (4, 8, 200, 200), dtype=jnp.float32)
    y_big = straight_through_estimator(x_big)
    y_big = jax.block_until_ready(y_big)
    y_big_ref = (x_big > 0).astype(jnp.float32)
    assert y_big.shape == x_big.shape
    assert bool(jnp.all(y_big == y_big_ref))

    print("KERNEL_OK")
</pallas_src>

<mosaic_0001>
module attributes {stable_mosaic.version = 11 : i64} {
  func.func @_ste_kernel(%arg0: i32, %arg1: memref<8x1024xf32, #tpu.memory_space<vmem>>, %arg2: memref<8x1024xf32, #tpu.memory_space<vmem>>) attributes {dimension_semantics = [#tpu.dimension_semantics<parallel>], iteration_bounds = array<i64: 1>, scalar_prefetch = 0 : i64, scratch_operands = 0 : i64, tpu.core_type = #tpu.core_type<tc>, window_params = [{transform_indices = @transform_0, window_bounds = array<i64: 8, 1024>}, {transform_indices = @transform_1, window_bounds = array<i64: 8, 1024>}]} {
    %c0 = arith.constant 0 : index
    %c0_0 = arith.constant 0 : index
    %0 = vector.load %arg1[%c0, %c0_0] : memref<8x1024xf32, #tpu.memory_space<vmem>>, vector<8x1024xf32>
    %cst = arith.constant 0.000000e+00 : f32
    %1 = vector.broadcast %cst : f32 to vector<8x1024xf32>
    %2 = arith.cmpf ogt, %0, %1 : vector<8x1024xf32>
    %3 = arith.extui %2 : vector<8x1024xi1> to vector<8x1024xi32>
    %4 = arith.sitofp %3 : vector<8x1024xi32> to vector<8x1024xf32>
    %c0_1 = arith.constant 0 : index
    %c0_2 = arith.constant 0 : index
    %5 = vector.load %arg2[%c0_1, %c0_2] : memref<8x1024xf32, #tpu.memory_space<vmem>>, vector<8x1024xf32>
    tpu.vector_store %arg2[%c0_1, %c0_2], %4 {strides = array<i32>} : memref<8x1024xf32, #tpu.memory_space<vmem>>, vector<8x1024xf32>,
    return
  }
  func.func @transform_0(%arg0: i32) -> (i32, i32) {
    %c0_i32 = arith.constant 0 : i32
    %c0_i32_0 = arith.constant 0 : i32
    return %arg0, %c0_i32 : i32, i32
  }
  func.func @transform_1(%arg0: i32) -> (i32, i32) {
    %c0_i32 = arith.constant 0 : i32
    %c0_i32_0 = arith.constant 0 : i32
    return %arg0, %c0_i32 : i32, i32
  }
}

</mosaic_0001>

<bundles_post_ra>
// kernel: tpu_custom_call.1
= control target key start
LH: loop header
LB: loop body
LE: loop exit
PB: predicated region body
PF: predicated region fallthrough
CT: control target
= control target key end

     0   :  { %6 = vsyncpa [#allocation3], 0  ;;  %s172_s0 = inlined_call_operand.hbm [shape: f32[8,1024], index: 0, kind: input, shape index: {}]   ;;  %s173_s1 = inlined_call_operand.hbm [shape: f32[8,1024], index: 1, kind: output, shape index: {}]  }
   0x1   :  { %7 = vsyncpa [#allocation4], 0  ;;  %s135_s6 = smov [#allocation2]   ;;  %s87_s10 = scalar_lea.hbm %s172_s0, 1024 }
   0x2   :  { %s14_s7 = sshll.u32 %s135_s6, 4  ;;  %p88_p0 = scmp.ne.s32.totalorder %s172_s0, %s87_s10  ;;  %s15_s7 = int_to_ptr.vmem [resolvable:$true] %s14_s7 }
   0x3   :  { %p91_p1 = scmp.lt.u32.totalorder %s87_s10, %s172_s0 }
   0x5   :  { %p93_p2 = pnand %p91_p1, %p88_p0 }
   0x7   :  { %96 = shalt.err (!%p93_p2)
}
   0x8   :  { %s97_s15 = scalar_lea.vmem %s15_s7, 1024  ;;  %p102_p4 = scmp.lt.s32.totalorder %s15_s7, %s15_s7 }
   0x9   :  { %p98_p3 = scmp.ne.s32.totalorder %s15_s7, %s97_s15  ;;  %p103_p5 = scmp.lt.s32.totalorder %s97_s15, %s97_s15 }
   0xb   :  { %p104_p6 = por %p103_p5, %p102_p4 }
   0xd   :  { %p105_p7 = pnand %p104_p6, %p98_p3 }
   0xf   :  { %108 = shalt.err (!%p105_p7)
}
  0x10   :  { %17 = dma.hbm_to_vmem [thread:$0]  %s172_s0, 1024, %s15_s7, [#allocation3]  }
  0x11   :  { %131 = dma.done.wait [#allocation3], 1024  }
  0x12   :  { %132 = vsyncadd [#allocation3], 4294966272  ;;  %v21_v0 = vld [vmem:[#allocation2] sm:$0xff]  ;;  %v22_v1 = vld [vmem:[#allocation2 + $0x8] sm:$0xff]  ;;  %s136_s18 = smov [#allocation5]   ;;  %v137_v6 = vmov 0.0  }
  0x13   :  { %v23_v2 = vld [vmem:[#allocation2 + $0x10] sm:$0xff]  ;;  %s67_s19 = sshll.u32 %s136_s18, 4  ;;  %vm29_vm0 = vcmp.gt.f32.partialorder %v21_v0, 0.0  ;;  %vm30_vm1 = vcmp.gt.f32.partialorder %v22_v1, 0.0  ;;  %v24_v3 = vld [vmem:[#allocation2 + $0x18] sm:$0xff]  ;;  %v25_v4 = vld [vmem:[#allocation2 + $0x20] sm:$0xff]  ;;  %s68_s19 = int_to_ptr.vmem [resolvable:$true] %s67_s19 }
  0x14   :  { %vm31_vm2 = vcmp.gt.f32.partialorder %v23_v2, 0.0  ;;  %v26_v5 = vld [vmem:[#allocation2 + $0x28] sm:$0xff]  ;;  %v76_v7 = vsel %vm29_vm0, 1.0, %v137_v6  ;;  %v77_v8 = vsel %vm30_vm1, 1.0, %v137_v6  ;;  %vm32_vm3 = vcmp.gt.f32.partialorder %v24_v3, 0.0  ;;  %v27_v10 = vld [vmem:[#allocation2 + $0x30] sm:$0xff]  ;;  %p114_p9 = scmp.lt.s32.totalorder %s68_s19, %s68_s19 }
  0x15   :  { %v78_v9 = vsel %vm31_vm2, 1.0, %v137_v6  ;;  %v28_v11 = vld [vmem:[#allocation2 + $0x38] sm:$0xff]  ;;  %53 = vst [vmem:[#allocation5] sm:$0xff] %v76_v7  ;;  %54 = vst [vmem:[#allocation5 + $0x8] sm:$0xff] %v77_v8  ;;  %v79_v12 = vsel %vm32_vm3, 1.0, %v137_v6  ;;  %vm33_vm4 = vcmp.gt.f32.partialorder %v25_v4, 0.0 }
  0x16   :  { %55 = vst [vmem:[#allocation5 + $0x10] sm:$0xff] %v78_v9  ;;  %vm34_vm5 = vcmp.gt.f32.partialorder %v26_v5, 0.0  ;;  %vm35_vm6 = vcmp.gt.f32.partialorder %v27_v10, 0.0  ;;  %56 = vst [vmem:[#allocation5 + $0x18] sm:$0xff] %v79_v12  ;;  %v80_v13 = vsel %vm33_vm4, 1.0, %v137_v6  ;;  %vm36_vm7 = vcmp.gt.f32.partialorder %v28_v11, 0.0 }
  0x17   :  { %v81_v14 = vsel %vm34_vm5, 1.0, %v137_v6  ;;  %v82_v15 = vsel %vm35_vm6, 1.0, %v137_v6  ;;  %57 = vst [vmem:[#allocation5 + $0x20] sm:$0xff] %v80_v13  ;;  %v83_v16 = vsel %vm36_vm7, 1.0, %v137_v6  ;;  %s109_s0 = scalar_lea.vmem %s68_s19, 1024 }
  0x18   :  { %58 = vst [vmem:[#allocation5 + $0x28] sm:$0xff] %v81_v14  ;;  %59 = vst [vmem:[#allocation5 + $0x30] sm:$0xff] %v82_v15  ;;  %p110_p8 = scmp.ne.s32.totalorder %s68_s19, %s109_s0  ;;  %p115_p10 = scmp.lt.s32.totalorder %s109_s0, %s109_s0 }
  0x19   :  { %60 = vst [vmem:[#allocation5 + $0x38] sm:$0xff] %v83_v16 }
  0x1a   :  { %p116_p11 = por %p115_p10, %p114_p9 }
  0x1c   :  { %p117_p12 = pnand %p116_p11, %p110_p8 }
  0x1e   :  { %120 = shalt.err (!%p117_p12)
}
  0x1f   :  { %s121_s22 = scalar_lea.hbm %s173_s1, 1024 }
  0x20   :  { %p122_p13 = scmp.ne.s32.totalorder %s173_s1, %s121_s22  ;;  %p125_p0 = scmp.lt.u32.totalorder %s121_s22, %s173_s1 }
  0x22   :  { %p127_p1 = pnand %p125_p0, %p122_p13 }
  0x24   :  { %130 = shalt.err (!%p127_p1)
}
  0x25   :  { %70 = dma.vmem_to_hbm [thread:$0]  %s68_s19, 1024, %s173_s1, [#allocation4]  }
  0x26   :  { %133 = dma.done.wait [#allocation4], 1024  }
  0x27   :  { %134 = vsyncadd [#allocation4], 4294966272 }
  0x28   :  { %74 = vsyncpa [#allocation3], 1 }
  0x29   :  { %75 = vsyncpa [#allocation4], 1 }

</bundles_post_ra>
